<compile_context>
chip_gen: v7x
topology: tpu7x:2x2x1
jax: 0.10.0
libtpu: 0.0.40
codegen_flags: <defaults>
</compile_context>

<pallas_src>
import jax
import jax.numpy as jnp
from jax.experimental import pallas as pl
from jax.experimental.pallas import tpu as pltpu


def _policy_kernel(x_ref, w1_ref, b1_ref, w2_ref, b2_ref, w3_ref, b3_ref, o_ref):
    # Lane-dense layout: features on sublanes, batch on lanes.
    wdt = w1_ref.dtype                                                    # bf16 (or f32 fallback)
    x = x_ref[...]                                                        # (8, T) wdt

    h1 = jnp.dot(w1_ref[...], x, preferred_element_type=jnp.float32)      # (128, T) f32 acc
    h1 = jnp.maximum(h1 + b1_ref[...], 0.0)                               # ReLU (VPU)

    h2 = jnp.dot(w2_ref[...], h1.astype(wdt),
                 preferred_element_type=jnp.float32)                      # (128, T) f32 acc
    h2 = jnp.maximum(h2 + b2_ref[...], 0.0)                               # ReLU (VPU)

    y = jnp.dot(w3_ref[...], h2.astype(wdt),
                preferred_element_type=jnp.float32)                       # (8, T) f32 acc
    y = y + b3_ref[...]

    # softplus(y) + 1e-4 on rows 1 and 3 (std columns); identity elsewhere.
    # Epilogue is free under the MXU bound (EUP/VPU slots).
    sp = jnp.logaddexp(y, 0.0) + 1e-4                  # numerically-stable softplus
    row = jax.lax.broadcasted_iota(jnp.int32, y.shape, 0)
    is_std_row = (row == 1) | (row == 3)
    o_ref[...] = jnp.where(is_std_row, sp, y)


def _round_up(n, m):
    return pl.cdiv(n, m) * m


def _prep_params(params, use_bf16=True):
    """Pad to sublane-aligned shapes and cast weights to the MXU dtype."""
    w1, b1, w2, b2, w3, b3 = params
    wdt = jnp.bfloat16 if use_bf16 else jnp.float32
    w1p = jnp.pad(w1, ((0, 0), (0, 8 - w1.shape[1])))    # (128, 8), K padded with zeros
    w3p = jnp.pad(w3, ((0, 8 - w3.shape[0]), (0, 0)))    # (8, 128), extra out-rows zero
    b3p = jnp.pad(b3, ((0, 8 - b3.shape[0]), (0, 0)))    # (8, 1)
    return (w1p.astype(wdt), b1, w2.astype(wdt), b2, w3p.astype(wdt), b3p)


def policy_network_forward(x, params, *, tile_b=4096, use_bf16=True):
    """x: (B, 6) float32 -> (B, 4) float32 ([mean0, std1, mean2, std3])."""
    B, F = x.shape
    w1, b1, w2, b2, w3, b3 = _prep_params(params, use_bf16=use_bf16)
    in_dtype = w1.dtype

    # Sanitize tile and choose the grid.
    tile_b = max(128, _round_up(int(tile_b), 128))       # positive multiple of 128
    padded_b = _round_up(max(B, 1), 128)
    num_steps = pl.cdiv(padded_b, tile_b)
    if padded_b >= 256:
        num_steps = max(num_steps, 2)                    # v7x: keep both TensorCores busy
    tile = _round_up(pl.cdiv(padded_b, num_steps), 128)  # lane tile, multiple of 128
    padded_b = num_steps * tile
    grid = (num_steps,)

    # Lane-dense layout: batch on the lane (last) axis; pad features 6->8 and
    # batch up to the padded size; cast to the matmul dtype in the same op.
    # TODO(synk): if producers/consumers can use (8, B)/(8, B) layouts directly,
    # these wrapper transposes/pads can be dropped entirely.
    xt = jnp.pad(jnp.transpose(x), ((0, 8 - F), (0, padded_b - B))).astype(in_dtype)

    batch_map = lambda i: (0, i)    # tile over batch (lane axis)
    const_map = lambda i: (0, 0)    # weights/biases resident across the grid

    out_t = pl.pallas_call(
        _policy_kernel,
        out_shape=jax.ShapeDtypeStruct((8, padded_b), jnp.float32),
        grid=grid,
        in_specs=[
            pl.BlockSpec((8, tile), batch_map),      # x tile (bf16)
            pl.BlockSpec(w1.shape, const_map),       # (128, 8)
            pl.BlockSpec(b1.shape, const_map),       # (128, 1) f32
            pl.BlockSpec(w2.shape, const_map),       # (128, 128)
            pl.BlockSpec(b2.shape, const_map),       # (128, 1) f32
            pl.BlockSpec(w3.shape, const_map),       # (8, 128)
            pl.BlockSpec(b3.shape, const_map),       # (8, 1) f32
        ],
        out_specs=pl.BlockSpec((8, tile), batch_map),
        compiler_params=pltpu.CompilerParams(
            dimension_semantics=("parallel",),        # shard batch across TCs (v7x)
            vmem_limit_bytes=32 * 1024 * 1024,        # ample headroom on all chips
        ),
    )(xt, w1, b1, w2, b2, w3, b3)

    return jnp.transpose(out_t[:4, :B])               # (B, 4)


def init_params(key):
    """Deterministic init matching the PyTorch Linear shapes.

    Weights are kept in PyTorch (out_features, in_features) orientation since
    the kernel computes W @ x in the (feature, batch) layout.
    """
    k1, k2, k3, k4, k5, k6 = jax.random.split(key, 6)

    def uniform(k, shape, fan_in):
        bound = 1.0 / jnp.sqrt(fan_in)
        return jax.random.uniform(k, shape, jnp.float32, -bound, bound)

    w1 = uniform(k1, (128, 6), 6.0)      # Linear(6, 128).weight
    b1 = uniform(k2, (128, 1), 6.0)      # Linear(6, 128).bias
    w2 = uniform(k3, (128, 128), 128.0)  # Linear(128, 128).weight
    b2 = uniform(k4, (128, 1), 128.0)    # Linear(128, 128).bias
    w3 = uniform(k5, (4, 128), 128.0)    # Linear(128, 4).weight
    b3 = uniform(k6, (4, 1), 128.0)      # Linear(128, 4).bias
    return (w1, b1, w2, b2, w3, b3)


def _reference_forward(x, params):
    """Pure-JAX f32 reference for correctness check (standard (B, F) layout)."""
    w1, b1, w2, b2, w3, b3 = params
    h1 = jnp.maximum(x @ w1.T + b1.T, 0.0)
    h2 = jnp.maximum(h1 @ w2.T + b2.T, 0.0)
    y = h2 @ w3.T + b3.T
    sp = jnp.logaddexp(y, 0.0) + 1e-4
    return jnp.concatenate(
        [y[:, 0:1], sp[:, 1:2], y[:, 2:3], sp[:, 3:4]], axis=1
    )


if __name__ == "__main__":
    key = jax.random.PRNGKey(0)
    k_params, k_x1, k_x2 = jax.random.split(key, 3)

    params = init_params(k_params)

    # Small batch (single grid step after padding to one 128-wide tile),
    # bf16 matmuls with f32 accumulation (default fast path).
    B1 = 8
    x1 = jax.random.normal(k_x1, (B1, 6), dtype=jnp.float32)
    out1 = jax.block_until_ready(policy_network_forward(x1, params))
    ref1 = _reference_forward(x1, params)
    assert out1.shape == (B1, 4)
    assert jnp.allclose(out1, ref1, atol=3e-2, rtol=2e-2)

    # Ragged batch with a multi-step grid (exercises padding + resident weights),
    # caller-supplied small tile.
    B2 = 300
    x2 = jax.random.normal(k_x2, (B2, 6), dtype=jnp.float32)
    out2 = jax.block_until_ready(policy_network_forward(x2, params, tile_b=128))
    ref2 = _reference_forward(x2, params)
    assert out2.shape == (B2, 4)
    assert jnp.allclose(out2, ref2, atol=3e-2, rtol=2e-2)

    # f32 fallback path: exact parity with the f32 reference.
    out2_f32 = jax.block_until_ready(
        policy_network_forward(x2, params, use_bf16=False)
    )
    assert jnp.allclose(out2_f32, ref2, atol=1e-4, rtol=1e-5)

    print("KERNEL_OK")
</pallas_src>

<mosaic_0001>
module attributes {stable_mosaic.version = 11 : i64} {
  func.func @_policy_kernel(%arg0: i32, %arg1: memref<8x128xbf16, #tpu.memory_space<vmem>>, %arg2: memref<128x8xbf16, #tpu.memory_space<vmem>>, %arg3: memref<128x1xf32, #tpu.memory_space<vmem>>, %arg4: memref<128x128xbf16, #tpu.memory_space<vmem>>, %arg5: memref<128x1xf32, #tpu.memory_space<vmem>>, %arg6: memref<8x128xbf16, #tpu.memory_space<vmem>>, %arg7: memref<8x1xf32, #tpu.memory_space<vmem>>, %arg8: memref<8x128xf32, #tpu.memory_space<vmem>>) attributes {dimension_semantics = [#tpu.dimension_semantics<parallel>], iteration_bounds = array<i64: 1>, scalar_prefetch = 0 : i64, scratch_operands = 0 : i64, tpu.core_type = #tpu.core_type<tc>, window_params = [{transform_indices = @transform_0, window_bounds = array<i64: 8, 128>}, {pipeline_mode = #tpu.pipeline_mode<synchronous>, transform_indices = @transform_1, window_bounds = array<i64: 128, 8>}, {pipeline_mode = #tpu.pipeline_mode<synchronous>, transform_indices = @transform_2, window_bounds = array<i64: 128, 1>}, {pipeline_mode = #tpu.pipeline_mode<synchronous>, transform_indices = @transform_3, window_bounds = array<i64: 128, 128>}, {pipeline_mode = #tpu.pipeline_mode<synchronous>, transform_indices = @transform_4, window_bounds = array<i64: 128, 1>}, {pipeline_mode = #tpu.pipeline_mode<synchronous>, transform_indices = @transform_5, window_bounds = array<i64: 8, 128>}, {pipeline_mode = #tpu.pipeline_mode<synchronous>, transform_indices = @transform_6, window_bounds = array<i64: 8, 1>}, {transform_indices = @transform_7, window_bounds = array<i64: 8, 128>}]} {
    %c0 = arith.constant 0 : index
    %c0_0 = arith.constant 0 : index
    %0 = vector.load %arg1[%c0, %c0_0] : memref<8x128xbf16, #tpu.memory_space<vmem>>, vector<8x128xbf16>
    %c0_1 = arith.constant 0 : index
    %c0_2 = arith.constant 0 : index
    %1 = vector.load %arg2[%c0_1, %c0_2] : memref<128x8xbf16, #tpu.memory_space<vmem>>, vector<128x8xbf16>
    %cst = arith.constant dense<0.000000e+00> : vector<128x128xf32>
    %2 = tpu.matmul %1, %0, %cst {dimension_numbers = #tpu.dot_dimension_numbers<[1], [0], [0], [1], [0, 0, 1, 1], [], []>} : vector<128x8xbf16>, vector<8x128xbf16>, vector<128x128xf32> -> vector<128x128xf32>
    %c0_3 = arith.constant 0 : index
    %c0_4 = arith.constant 0 : index
    %3 = vector.load %arg3[%c0_3, %c0_4] : memref<128x1xf32, #tpu.memory_space<vmem>>, vector<128x1xf32>
    %4 = vector.broadcast %3 : vector<128x1xf32> to vector<128x128xf32>
    %5 = arith.addf %2, %4 : vector<128x128xf32>
    %cst_5 = arith.constant 0.000000e+00 : f32
    %6 = vector.broadcast %cst_5 : f32 to vector<128x128xf32>
    %7 = arith.maximumf %5, %6 : vector<128x128xf32>
    %c0_6 = arith.constant 0 : index
    %c0_7 = arith.constant 0 : index
    %8 = vector.load %arg4[%c0_6, %c0_7] : memref<128x128xbf16, #tpu.memory_space<vmem>>, vector<128x128xbf16>
    %9 = arith.truncf %7 : vector<128x128xf32> to vector<128x128xbf16>
    %cst_8 = arith.constant dense<0.000000e+00> : vector<128x128xf32>
    %10 = tpu.matmul %8, %9, %cst_8 {dimension_numbers = #tpu.dot_dimension_numbers<[1], [0], [0], [1], [0, 0, 1, 1], [], []>} : vector<128x128xbf16>, vector<128x128xbf16>, vector<128x128xf32> -> vector<128x128xf32>
    %c0_9 = arith.constant 0 : index
    %c0_10 = arith.constant 0 : index
    %11 = vector.load %arg5[%c0_9, %c0_10] : memref<128x1xf32, #tpu.memory_space<vmem>>, vector<128x1xf32>
    %12 = vector.broadcast %11 : vector<128x1xf32> to vector<128x128xf32>
    %13 = arith.addf %10, %12 : vector<128x128xf32>
    %cst_11 = arith.constant 0.000000e+00 : f32
    %14 = vector.broadcast %cst_11 : f32 to vector<128x128xf32>
    %15 = arith.maximumf %13, %14 : vector<128x128xf32>
    %c0_12 = arith.constant 0 : index
    %c0_13 = arith.constant 0 : index
    %16 = vector.load %arg6[%c0_12, %c0_13] : memref<8x128xbf16, #tpu.memory_space<vmem>>, vector<8x128xbf16>
    %17 = arith.truncf %15 : vector<128x128xf32> to vector<128x128xbf16>
    %cst_14 = arith.constant dense<0.000000e+00> : vector<8x128xf32>
    %18 = tpu.matmul %16, %17, %cst_14 {dimension_numbers = #tpu.dot_dimension_numbers<[1], [0], [0], [1], [0, 0, 1, 1], [], []>} : vector<8x128xbf16>, vector<128x128xbf16>, vector<8x128xf32> -> vector<8x128xf32>
    %c0_15 = arith.constant 0 : index
    %c0_16 = arith.constant 0 : index
    %19 = vector.load %arg7[%c0_15, %c0_16] : memref<8x1xf32, #tpu.memory_space<vmem>>, vector<8x1xf32>
    %20 = vector.broadcast %19 : vector<8x1xf32> to vector<8x128xf32>
    %21 = arith.addf %18, %20 : vector<8x128xf32>
    %cst_17 = arith.constant 0.000000e+00 : f32
    %22 = vector.broadcast %cst_17 : f32 to vector<8x128xf32>
    %23 = arith.maximumf %21, %22 : vector<8x128xf32>
    %24 = vector.broadcast %cst_17 : f32 to vector<8x128xf32>
    %25 = arith.subf %21, %24 : vector<8x128xf32>
    %26 = arith.cmpf one, %25, %25 : vector<8x128xf32>
    %27 = vector.broadcast %cst_17 : f32 to vector<8x128xf32>
    %28 = arith.addf %21, %27 : vector<8x128xf32>
    %29 = math.absf %25 : vector<8x128xf32>
    %cst_18 = arith.constant 0.000000e+00 : f32
    %30 = vector.broadcast %cst_18 : f32 to vector<8x128xf32>
    %31 = arith.subf %30, %29 : vector<8x128xf32>
    %32 = math.exp %31 : vector<8x128xf32>
    %33 = math.log1p %32 : vector<8x128xf32>
    %34 = arith.addf %23, %33 : vector<8x128xf32>
    %35 = arith.select %26, %28, %34 : vector<8x128xi1>, vector<8x128xf32>
    %cst_19 = arith.constant 9.99999974E-5 : f32
    %36 = vector.broadcast %cst_19 : f32 to vector<8x128xf32>
    %37 = arith.addf %35, %36 : vector<8x128xf32>
    %38 = tpu.iota {dimensions = array<i32: 0>} : vector<8x128xi32>
    %c1_i32 = arith.constant 1 : i32
    %39 = vector.broadcast %c1_i32 : i32 to vector<8x128xi32>
    %40 = arith.cmpi eq, %38, %39 : vector<8x128xi32>
    %c3_i32 = arith.constant 3 : i32
    %41 = vector.broadcast %c3_i32 : i32 to vector<8x128xi32>
    %42 = arith.cmpi eq, %38, %41 : vector<8x128xi32>
    %43 = arith.ori %40, %42 : vector<8x128xi1>
    %44 = arith.select %43, %37, %21 : vector<8x128xi1>, vector<8x128xf32>
    %c0_20 = arith.constant 0 : index
    %c0_21 = arith.constant 0 : index
    %45 = vector.load %arg8[%c0_20, %c0_21] : memref<8x128xf32, #tpu.memory_space<vmem>>, vector<8x128xf32>
    tpu.vector_store %arg8[%c0_20, %c0_21], %44 {strides = array<i32>} : memref<8x128xf32, #tpu.memory_space<vmem>>, vector<8x128xf32>,
    return
  }
  func.func @transform_0(%arg0: i32) -> (i32, i32) {
    %c0_i32 = arith.constant 0 : i32
    %c0_i32_0 = arith.constant 0 : i32
    return %c0_i32, %arg0 : i32, i32
  }
  func.func @transform_1(%arg0: i32) -> (i32, i32) {
    %c0_i32 = arith.constant 0 : i32
    %c0_i32_0 = arith.constant 0 : i32
    %c0_i32_1 = arith.constant 0 : i32
    return %c0_i32, %c0_i32_0 : i32, i32
  }
  func.func @transform_2(%arg0: i32) -> (i32, i32) {
    %c0_i32 = arith.constant 0 : i32
    %c0_i32_0 = arith.constant 0 : i32
    %c0_i32_1 = arith.constant 0 : i32
    return %c0_i32, %c0_i32_0 : i32, i32
  }
  func.func @transform_3(%arg0: i32) -> (i32, i32) {
    %c0_i32 = arith.constant 0 : i32
    %c0_i32_0 = arith.constant 0 : i32
    %c0_i32_1 = arith.constant 0 : i32
    return %c0_i32, %c0_i32_0 : i32, i32
  }
  func.func @transform_4(%arg0: i32) -> (i32, i32) {
    %c0_i32 = arith.constant 0 : i32
    %c0_i32_0 = arith.constant 0 : i32
    %c0_i32_1 = arith.constant 0 : i32
    return %c0_i32, %c0_i32_0 : i32, i32
  }
  func.func @transform_5(%arg0: i32) -> (i32, i32) {
    %c0_i32 = arith.constant 0 : i32
    %c0_i32_0 = arith.constant 0 : i32
    %c0_i32_1 = arith.constant 0 : i32
    return %c0_i32, %c0_i32_0 : i32, i32
  }
  func.func @transform_6(%arg0: i32) -> (i32, i32) {
    %c0_i32 = arith.constant 0 : i32
    %c0_i32_0 = arith.constant 0 : i32
    %c0_i32_1 = arith.constant 0 : i32
    return %c0_i32, %c0_i32_0 : i32, i32
  }
  func.func @transform_7(%arg0: i32) -> (i32, i32) {
    %c0_i32 = arith.constant 0 : i32
    %c0_i32_0 = arith.constant 0 : i32
    return %c0_i32, %arg0 : i32, i32
  }
}

</mosaic_0001>

<bundles_post_ra>
// kernel: tpu_custom_call.1
= control target key start
LH: loop header
LB: loop body
LE: loop exit
PB: predicated region body
PF: predicated region fallthrough
CT: control target
= control target key end

     0   :  { %vm206_vm0 = vcmask 1043456   ;;  %vm181_vm1 = vcmask 64512   ;;  %v878_v5 = vmov 0   ;;  %s1104_s0 = inlined_call_operand.vmem [shape: bf16[8,128], index: 0, kind: input, shape index: {}]   ;;  %s1105_s1 = inlined_call_operand.vmem [shape: bf16[128,8], index: 1, kind: input, shape index: {}]   ;;  %s1106_s2 = inlined_call_operand.vmem [shape: f32[128,1], index: 2, kind: input, shape index: {}]   ;;  %s1107_s3 = inlined_call_operand.vmem [shape: bf16[128,128], index: 3, kind: input, shape index: {}]   ;;  %s1108_s4 = inlined_call_operand.vmem [shape: f32[128,1], index: 4, kind: input, shape index: {}]   ;;  %s1109_s5 = inlined_call_operand.vmem [shape: bf16[8,128], index: 5, kind: input, shape index: {}]   ;;  %s1110_s6 = inlined_call_operand.vmem [shape: f32[8,1], index: 6, kind: input, shape index: {}]   ;;  %s1111_s7 = inlined_call_operand.hbm [shape: f32[8,128], index: 7, kind: output, shape index: {}]  }
   0x1   :  { %v28_v0 = vld [vmem:[%s1104_s0] sm:$0xf]  ;;  %v835_v3 = vld [vmem:[%s1105_s1 + $0x8] sm:$0xff]   ;;  %v836_v4 = vld [vmem:[%s1105_s1 + $0x10] sm:$0xff]   ;;  %832 = vset.pattern.permute.xlu0 %v878_v5  ;;  %833 = vset.pattern.permute.xlu1 %v878_v5 }
   0x2   :  { %v834_v1 = vld [vmem:[%s1105_s1] sm:$0xff]   ;;  %827 = vmatprep.subr.msk.bf16.mxu0 %vm206_vm0, %v28_v0  ;;  %v208_v2 = vsel %vm206_vm0, %v28_v0, 0  ;;  %v46_v7 = vld [vmem:[%s1106_s2 + $0x8] sm:$0xff]  ;;  %v837_v8 = vld [vmem:[%s1105_s1 + $0x18] sm:$0xff]  }
   0x3   :  { %758 = vmatpush3.bf16.msra.mxu0 %v208_v2  ;;  %759 = vmatprep.mubr.msk.bf16.mxu0 %vm181_vm1, %v834_v1  ;;  %v45_v6 = vld [vmem:[%s1106_s2] sm:$0xff]  ;;  %v47_v9 = vld [vmem:[%s1106_s2 + $0x10] sm:$0xff]  ;;  %v48_v11 = vld [vmem:[%s1106_s2 + $0x18] sm:$0xff] }
   0x4   :  { %63 = vperm.xlu0 %832, %v45_v6   ;;  %v838_v10 = vld [vmem:[%s1105_s1 + $0x20] sm:$0xff]   ;;  %73 = vperm.xlu1 %833, %v47_v9   ;;  %v50_v13 = vld [vmem:[%s1106_s2 + $0x28] sm:$0xff]  ;;  %v51_v14 = vld [vmem:[%s1106_s2 + $0x30] sm:$0xff] }
   0x5   :  { %v49_v12 = vld [vmem:[%s1106_s2 + $0x20] sm:$0xff]  ;;  %v839_v15 = vld [vmem:[%s1105_s1 + $0x28] sm:$0xff]   ;;  %v840_v16 = vld [vmem:[%s1105_s1 + $0x30] sm:$0xff]  }
   0x6   :  { %760 = vmatmul.mubr.msk.bf16.vlgmr.msra.gmra.mrb[0].mxu0 %vm181_vm1, %v835_v3  ;;  %v53_v17 = vld [vmem:[%s1106_s2 + $0x40] sm:$0xff]  ;;  %v52_v18 = vld [vmem:[%s1106_s2 + $0x38] sm:$0xff]  ;;  %v54_v19 = vld [vmem:[%s1106_s2 + $0x48] sm:$0xff] }
   0x7   :  { %763 = vmatprep.mubr.msk.bf16.mxu0 %vm181_vm1, %v836_v4  ;;  %v55_v20 = vld [vmem:[%s1106_s2 + $0x50] sm:$0xff]  ;;  %v841_v21 = vld [vmem:[%s1105_s1 + $0x38] sm:$0xff]  }
   0x8   :  { %68 = vperm.xlu0 %832, %v46_v7   ;;  %78 = vperm.xlu1 %833, %v48_v11  }
   0xc   :  { %83 = vperm.xlu0 %832, %v49_v12   ;;  %88 = vperm.xlu1 %833, %v50_v13  }
   0xe   :  { %764 = vmatmul.mubr.msk.bf16.gmra.mrb[4].mxu0 %vm181_vm1, %v837_v8 }
   0xf   :  { %767 = vmatprep.mubr.msk.bf16.mxu0 %vm181_vm1, %v838_v10 }
  0x10   :  { %93 = vperm.xlu0 %832, %v51_v14   ;;  %98 = vperm.xlu1 %833, %v52_v18  }
  0x14   :  { %103 = vperm.xlu0 %832, %v53_v17  }
  0x16   :  { %768 = vmatmul.mubr.msk.bf16.gmra.mrb[8].mxu0 %vm181_vm1, %v839_v15 }
  0x17   :  { %771 = vmatprep.mubr.msk.bf16.mxu0 %vm181_vm1, %v840_v16 }
  0x18   :  { %12 = vsyncpa [#allocation3], 0  ;;  %108 = vperm.xlu1 %833, %v54_v19   ;;  %113 = vperm.xlu0 %832, %v55_v20   ;;  %v56_v22 = vld [vmem:[%s1106_s2 + $0x58] sm:$0xff]  ;;  %v57_v23 = vld [vmem:[%s1106_s2 + $0x60] sm:$0xff]  ;;  %vm880_vm2 = vmmov 0  }
  0x19   :  { %v58_v24 = vld [vmem:[%s1106_s2 + $0x68] sm:$0xff]  ;;  %v59_v25 = vld [vmem:[%s1106_s2 + $0x70] sm:$0xff]  ;;  %v60_v26 = vld [vmem:[%s1106_s2 + $0x78] sm:$0xff] }
  0x1a   :  { %v347_v27 = vld [vmem:[%s1108_s4] sm:$0xff]  ;;  %v348_v28 = vld [vmem:[%s1108_s4 + $0x8] sm:$0xff]  ;;  %v349_v29 = vld [vmem:[%s1108_s4 + $0x10] sm:$0xff] }
  0x1b   :  { %v350_v30 = vld [vmem:[%s1108_s4 + $0x18] sm:$0xff]  ;;  %v351_v31 = vld [vmem:[%s1108_s4 + $0x20] sm:$0xff]  ;;  %v352_v32 = vld [vmem:[%s1108_s4 + $0x28] sm:$0xff] }
  0x1c   :  { %118 = vperm.xlu1 %833, %v56_v22   ;;  %123 = vperm.xlu0 %832, %v57_v23   ;;  %v353_v33 = vld [vmem:[%s1108_s4 + $0x30] sm:$0xff]  ;;  %v354_v34 = vld [vmem:[%s1108_s4 + $0x38] sm:$0xff]  ;;  %v355_v35 = vld [vmem:[%s1108_s4 + $0x40] sm:$0xff] }
  0x1d   :  { %v356_v36 = vld [vmem:[%s1108_s4 + $0x48] sm:$0xff]  ;;  %v357_v37 = vld [vmem:[%s1108_s4 + $0x50] sm:$0xff]  ;;  %v358_v38 = vld [vmem:[%s1108_s4 + $0x58] sm:$0xff] }
  0x1e   :  { %772 = vmatmul.mubr.msk.bf16.gmra.mrb[12].mxu0 %vm181_vm1, %v841_v21  ;;  %v359_v39 = vld [vmem:[%s1108_s4 + $0x60] sm:$0xff]  ;;  %v360_v40 = vld [vmem:[%s1108_s4 + $0x68] sm:$0xff]  ;;  %v361_v41 = vld [vmem:[%s1108_s4 + $0x70] sm:$0xff] }
  0x1f   :  { %v362_v42 = vld [vmem:[%s1108_s4 + $0x78] sm:$0xff]  ;;  %v613_v43 = vld [vmem:[%s1110_s6] sm:$0xff] }
  0x20   :  { %128 = vperm.xlu1 %833, %v58_v24   ;;  %133 = vperm.xlu0 %832, %v59_v25   ;;  %v842_v44 = vld [vmem:[%s1107_s3] sm:$0xff]  }
  0x21   :  { %791 = vmatprep.mubr.bf16.mxu1 %v842_v44 }
  0x24   :  { %138 = vperm.xlu1 %833, %v60_v26   ;;  %365 = vperm.xlu0 %832, %v347_v27  }
  0x28   :  { %370 = vperm.xlu1 %833, %v348_v28   ;;  %375 = vperm.xlu0 %832, %v349_v29  }
  0x2c   :  { %380 = vperm.xlu1 %833, %v350_v30   ;;  %385 = vperm.xlu0 %832, %v351_v31  }
  0x30   :  { %390 = vperm.xlu1 %833, %v352_v32   ;;  %395 = vperm.xlu0 %832, %v353_v33  }
  0x34   :  { %400 = vperm.xlu1 %833, %v354_v34   ;;  %405 = vperm.xlu0 %832, %v355_v35  }
  0x38   :  { %410 = vperm.xlu1 %833, %v356_v36   ;;  %415 = vperm.xlu0 %832, %v357_v37  }
  0x3c   :  { %420 = vperm.xlu1 %833, %v358_v38   ;;  %425 = vperm.xlu0 %832, %v359_v39  }
  0x40   :  { %430 = vperm.xlu1 %833, %v360_v40   ;;  %435 = vperm.xlu0 %832, %v361_v41  }
  0x44   :  { %440 = vperm.xlu1 %833, %v362_v42   ;;  %616 = vperm.xlu0 %832, %v613_v43  }
  0x83   :  { %v64_v45 = vpop.permute.xlu0 %63  ;;  %v74_v46 = vpop.permute.xlu1 %73 }
  0x87   :  { %v69_v47 = vpop.permute.xlu0 %68  ;;  %v79_v48 = vpop.permute.xlu1 %78 }
  0x8b   :  { %v84_v49 = vpop.permute.xlu0 %83  ;;  %v89_v50 = vpop.permute.xlu1 %88 }
  0x8f   :  { %v94_v51 = vpop.permute.xlu0 %93  ;;  %v99_v55 = vpop.permute.xlu1 %98 }
  0x93   :  { %v104_v63 = vpop.permute.xlu0 %103 }
  0x97   :  { %v109_v3 = vpop.permute.xlu1 %108  ;;  %v114_v12 = vpop.permute.xlu0 %113 }
  0x9b   :  { %v119_v16 = vpop.permute.xlu1 %118  ;;  %v124_v24 = vpop.permute.xlu0 %123 }
  0x9f   :  { %v129_v29 = vpop.permute.xlu1 %128  ;;  %v134_v36 = vpop.permute.xlu0 %133 }
  0xa3   :  { %v139_v41 = vpop.permute.xlu1 %138 }
  0xd9   :  { %v761_v52 = vpop.f32.mrb[0].mxu0 }
  0xda   :  { %v253_v53 = vadd.f32 %v761_v52, %v74_v46  ;;  %v244_v54 = vpop.f32.mrb[1].mxu0 }
  0xdb   :  { %v245_v56 = vadd.f32 %v244_v54, %v64_v45  ;;  %v762_v57 = vpop.f32.mrb[2].mxu0  ;;  %v844_v54 = vld [vmem:[%s1107_s3 + $0x10] sm:$0xff]  }
  0xdc   :  { %v256_v58 = vadd.f32 %v762_v57, %v79_v48  ;;  %v247_v59 = vpop.f32.mrb[3].mxu0  ;;  %v309_v61 = vmax.f32 %v253_v53, 0.0  ;;  %v843_v53 = vld [vmem:[%s1107_s3 + $0x8] sm:$0xff]  }
  0xdd   :  { %v248_v60 = vadd.f32 %v247_v59, %v69_v47  ;;  %v307_v0 = vmax.f32 %v245_v56, 0.0  ;;  %v846_v56 = vld [vmem:[%s1107_s3 + $0x20] sm:$0xff]   ;;  %v847_v57 = vld [vmem:[%s1107_s3 + $0x28] sm:$0xff]   ;;  %v849_v59 = vld [vmem:[%s1107_s3 + $0x38] sm:$0xff]  }
  0xde   :  { %v310_v62 = vmax.f32 %v256_v58, 0.0  ;;  %v848_v58 = vld [vmem:[%s1107_s3 + $0x30] sm:$0xff]  }
  0xdf   :  { %v308_v1 = vmax.f32 %v248_v60, 0.0  ;;  %v879_v60 = vmov 0.0  }
  0xe0   :  { %v340_v2 = vpack.c.bf16 %v310_v62, %v309_v61  ;;  %807 = vmatprep.subr.bf16.mxu0 %v879_v60  ;;  %823 = vmatprep.mubr.msk.bf16.mxu0 %vm880_vm2, %v879_v60  ;;  %v366_v61 = vpop.permute.xlu0 %365  ;;  %v371_v62 = vpop.permute.xlu1 %370 }
  0xe1   :  { %v765_v4 = vpop.f32.mrb[4].mxu0  ;;  %v339_v5 = vpack.c.bf16 %v308_v1, %v307_v0 }
  0xe2   :  { %v269_v6 = vadd.f32 %v765_v4, %v94_v51  ;;  %v260_v7 = vpop.f32.mrb[5].mxu0 }
  0xe3   :  { %v261_v8 = vadd.f32 %v260_v7, %v84_v49  ;;  %v766_v9 = vpop.f32.mrb[6].mxu0  ;;  %775 = vmatprep.subr.bf16.mxu1 %v339_v5 }
  0xe4   :  { %v272_v10 = vadd.f32 %v766_v9, %v99_v55  ;;  %v263_v11 = vpop.f32.mrb[7].mxu0  ;;  %776 = vmatpush3.bf16.msra.mxu1 %v339_v5  ;;  %v313_v14 = vmax.f32 %v269_v6, 0.0  ;;  %v845_v55 = vld [vmem:[%s1107_s3 + $0x18] sm:$0xff]   ;;  %v381_v0 = vpop.permute.xlu1 %380 }
  0xe5   :  { %v264_v13 = vadd.f32 %v263_v11, %v89_v50  ;;  %777 = vmatprep.subr.bf16.mxu1 %v340_v2  ;;  %v311_v17 = vmax.f32 %v261_v8, 0.0 }
  0xe6   :  { %v314_v15 = vmax.f32 %v272_v10, 0.0 }
  0xe7   :  { %v312_v18 = vmax.f32 %v264_v13, 0.0 }
  0xe8   :  { %v342_v19 = vpack.c.bf16 %v314_v15, %v313_v14  ;;  %778 = vmatpush3.bf16.msra.mxu1 %v340_v2  ;;  %v391_v2 = vpop.permute.xlu1 %390 }
  0xe9   :  { %v341_v20 = vpack.c.bf16 %v312_v18, %v311_v17  ;;  %v769_v21 = vpop.f32.mrb[8].mxu0 }
  0xea   :  { %v285_v22 = vadd.f32 %v769_v21, %v114_v12  ;;  %v276_v23 = vpop.f32.mrb[9].mxu0 }
  0xeb   :  { %v277_v25 = vadd.f32 %v276_v23, %v104_v63  ;;  %v770_v26 = vpop.f32.mrb[10].mxu0  ;;  %779 = vmatprep.subr.bf16.mxu1 %v341_v20  ;;  %v376_v63 = vpop.permute.xlu0 %375 }
  0xec   :  { %v288_v27 = vadd.f32 %v770_v26, %v119_v16  ;;  %v279_v28 = vpop.f32.mrb[11].mxu0  ;;  %780 = vmatpush3.bf16.msra.mxu1 %v341_v20  ;;  %v317_v31 = vmax.f32 %v285_v22, 0.0  ;;  %v401_v7 = vpop.permute.xlu1 %400 }
  0xed   :  { %v280_v30 = vadd.f32 %v279_v28, %v109_v3  ;;  %781 = vmatprep.subr.bf16.mxu1 %v342_v19  ;;  %v315_v33 = vmax.f32 %v277_v25, 0.0 }
  0xee   :  { %v318_v32 = vmax.f32 %v288_v27, 0.0 }
  0xef   :  { %v316_v34 = vmax.f32 %v280_v30, 0.0  ;;  %v386_v1 = vpop.permute.xlu0 %385 }
  0xf0   :  { %v344_v35 = vpack.c.bf16 %v318_v32, %v317_v31  ;;  %782 = vmatpush3.bf16.msra.mxu1 %v342_v19  ;;  %v411_v19 = vpop.permute.xlu1 %410 }
  0xf1   :  { %v343_v37 = vpack.c.bf16 %v316_v34, %v315_v33  ;;  %v773_v38 = vpop.f32.mrb[12].mxu0 }
  0xf2   :  { %v301_v39 = vadd.f32 %v773_v38, %v134_v36  ;;  %v292_v40 = vpop.f32.mrb[13].mxu0 }
  0xf3   :  { %v293_v42 = vadd.f32 %v292_v40, %v124_v24  ;;  %v774_v43 = vpop.f32.mrb[14].mxu0  ;;  %783 = vmatprep.subr.bf16.mxu1 %v343_v37  ;;  %v396_v3 = vpop.permute.xlu0 %395 }
  0xf4   :  { %v304_v44 = vadd.f32 %v774_v43, %v139_v41  ;;  %v295_v45 = vpop.f32.mrb[15].mxu0  ;;  %784 = vmatpush3.bf16.msra.mxu1 %v343_v37  ;;  %v321_v47 = vmax.f32 %v301_v39, 0.0  ;;  %v421_v32 = vpop.permute.xlu1 %420 }
  0xf5   :  { %v296_v46 = vadd.f32 %v295_v45, %v129_v29  ;;  %785 = vmatprep.subr.bf16.mxu1 %v344_v35  ;;  %v319_v49 = vmax.f32 %v293_v42, 0.0 }
  0xf6   :  { %v322_v48 = vmax.f32 %v304_v44, 0.0 }
  0xf7   :  { %v320_v50 = vmax.f32 %v296_v46, 0.0  ;;  %v406_v15 = vpop.permute.xlu0 %405 }
  0xf8   :  { %v346_v51 = vpack.c.bf16 %v322_v48, %v321_v47  ;;  %786 = vmatpush3.bf16.msra.mxu1 %v344_v35  ;;  %v431_v45 = vpop.permute.xlu1 %430 }
  0xf9   :  { %v345_v52 = vpack.c.bf16 %v320_v50, %v319_v49 }
  0xfb   :  { %787 = vmatprep.subr.bf16.mxu1 %v345_v52  ;;  %v416_v28 = vpop.permute.xlu0 %415 }
  0xfc   :  { %788 = vmatpush3.bf16.msra.mxu1 %v345_v52 }
  0xfd   :  { %789 = vmatprep.subr.bf16.mxu1 %v346_v51 }
  0xff   :  { %v426_v40 = vpop.permute.xlu0 %425 }
 0x100   :  { %790 = vmatpush3.bf16.msra.mxu1 %v346_v51 }
 0x103   :  { %792 = vmatmul.mubr.bf16.vlgmr.msra.gmra.mrb[0].mxu1 %v843_v53  ;;  %v436_v52 = vpop.permute.xlu0 %435 }
 0x104   :  { %795 = vmatprep.mubr.bf16.mxu1 %v844_v54 }
 0x10b   :  { %796 = vmatmul.mubr.bf16.gmra.mrb[4].mxu1 %v845_v55 }
 0x10c   :  { %799 = vmatprep.mubr.bf16.mxu1 %v846_v56 }
 0x113   :  { %800 = vmatmul.mubr.bf16.gmra.mrb[8].mxu1 %v847_v57  ;;  %v441_v57 = vpop.permute.xlu1 %440 }
 0x114   :  { %803 = vmatprep.mubr.bf16.mxu1 %v848_v58 }
 0x11b   :  { %804 = vmatmul.mubr.bf16.gmra.mrb[12].mxu1 %v849_v59 }
 0x1d6   :  { %v793_v4 = vpop.f32.mrb[0].mxu1 }
 0x1d7   :  { %v534_v5 = vadd.f32 %v793_v4, %v376_v63  ;;  %v525_v6 = vpop.f32.mrb[1].mxu1 }
 0x1d8   :  { %v526_v8 = vadd.f32 %v525_v6, %v366_v61  ;;  %v794_v9 = vpop.f32.mrb[2].mxu1  ;;  %v604_v6 = vld [vmem:[%s1109_s5] sm:$0xf]  ;;  %s881_s5 = smov [#allocation2]  }
 0x1d9   :  { %v537_v10 = vadd.f32 %v794_v9, %v381_v0  ;;  %v528_v11 = vpop.f32.mrb[3].mxu1  ;;  %v590_v13 = vmax.f32 %v534_v5, 0.0  ;;  %s691_s22 = sshll.u32 %s881_s5, 4  ;;  %s692_s22 = int_to_ptr.vmem [resolvable:$true] %s691_s22 }
 0x1da   :  { %v529_v12 = vadd.f32 %v528_v11, %v371_v62  ;;  %v588_v16 = vmax.f32 %v526_v8, 0.0  ;;  %s854_s23 = scalar_lea.vmem %s692_s22, 128  ;;  %p859_p1 = scmp.lt.s32.totalorder %s692_s22, %s692_s22 }
 0x1db   :  { %v591_v14 = vmax.f32 %v537_v10, 0.0  ;;  %p855_p0 = scmp.ne.s32.totalorder %s692_s22, %s854_s23  ;;  %p860_p2 = scmp.lt.s32.totalorder %s854_s23, %s854_s23 }
 0x1dc   :  { %v589_v17 = vmax.f32 %v529_v12, 0.0 }
 0x1dd   :  { %v606_v18 = vpack.c.bf16 %v591_v14, %v590_v13  ;;  %p861_p3 = por %p860_p2, %p859_p1 }
 0x1de   :  { %v605_v20 = vpack.c.bf16 %v589_v17, %v588_v16  ;;  %v797_v21 = vpop.f32.mrb[4].mxu1 }
 0x1df   :  { %v550_v22 = vadd.f32 %v797_v21, %v396_v3  ;;  %v541_v23 = vpop.f32.mrb[5].mxu1  ;;  %p862_p4 = pnand %p861_p3, %p855_p0 }
 0x1e0   :  { %v542_v24 = vadd.f32 %v541_v23, %v386_v1  ;;  %v798_v25 = vpop.f32.mrb[6].mxu1  ;;  %808 = vmatpush3.bf16.msra.mxu0 %v605_v20 }
 0x1e1   :  { %v553_v26 = vadd.f32 %v798_v25, %v401_v7  ;;  %v544_v27 = vpop.f32.mrb[7].mxu1  ;;  %809 = vmatprep.subr.bf16.mxu0 %v879_v60  ;;  %v594_v30 = vmax.f32 %v550_v22, 0.0  ;;  %v617_v7 = vpop.permute.xlu0 %616 }
 0x1e2   :  { %v545_v29 = vadd.f32 %v544_v27, %v391_v2  ;;  %v592_v33 = vmax.f32 %v542_v24, 0.0 }
 0x1e3   :  { %v595_v31 = vmax.f32 %v553_v26, 0.0 }
 0x1e4   :  { %v593_v34 = vmax.f32 %v545_v29, 0.0  ;;  %810 = vmatpush3.bf16.msra.mxu0 %v606_v18  ;;  %v678_v18 = vlaneseq }
 0x1e5   :  { %v608_v35 = vpack.c.bf16 %v595_v31, %v594_v30  ;;  %811 = vmatprep.subr.bf16.mxu0 %v879_v60 }
 0x1e6   :  { %v607_v36 = vpack.c.bf16 %v593_v34, %v592_v33  ;;  %v801_v37 = vpop.f32.mrb[8].mxu1  ;;  %v679_v21 = vshrl.u32 %v678_v18, 7 }
 0x1e7   :  { %v566_v38 = vadd.f32 %v801_v37, %v416_v28  ;;  %v557_v39 = vpop.f32.mrb[9].mxu1 }
 0x1e8   :  { %v558_v41 = vadd.f32 %v557_v39, %v406_v15  ;;  %v802_v42 = vpop.f32.mrb[10].mxu1  ;;  %812 = vmatpush3.bf16.msra.mxu0 %v607_v36  ;;  %vm680_vm4 = vcmp.eq.s32.totalorder %v679_v21, 1  ;;  %vm681_vm5 = vcmp.eq.s32.totalorder %v679_v21, 3 }
 0x1e9   :  { %v569_v43 = vadd.f32 %v802_v42, %v421_v32  ;;  %v560_v44 = vpop.f32.mrb[11].mxu1  ;;  %813 = vmatprep.subr.bf16.mxu0 %v879_v60  ;;  %v598_v47 = vmax.f32 %v566_v38, 0.0  ;;  %vm682_vm7 = vmor %vm680_vm4, %vm681_vm5 }
 0x1ea   :  { %v561_v46 = vadd.f32 %v560_v44, %v411_v19  ;;  %v596_v49 = vmax.f32 %v558_v41, 0.0 }
 0x1eb   :  { %v599_v48 = vmax.f32 %v569_v43, 0.0 }
 0x1ec   :  { %v597_v50 = vmax.f32 %v561_v46, 0.0  ;;  %814 = vmatpush3.bf16.msra.mxu0 %v608_v35 }
 0x1ed   :  { %v610_v51 = vpack.c.bf16 %v599_v48, %v598_v47  ;;  %815 = vmatprep.subr.bf16.mxu0 %v879_v60 }
 0x1ee   :  { %v609_v53 = vpack.c.bf16 %v597_v50, %v596_v49  ;;  %v805_v54 = vpop.f32.mrb[12].mxu1 }
 0x1ef   :  { %v582_v55 = vadd.f32 %v805_v54, %v436_v52  ;;  %v573_v56 = vpop.f32.mrb[13].mxu1 }
 0x1f0   :  { %v574_v58 = vadd.f32 %v573_v56, %v426_v40  ;;  %v806_v59 = vpop.f32.mrb[14].mxu1  ;;  %816 = vmatpush3.bf16.msra.mxu0 %v609_v53 }
 0x1f1   :  { %v585_v61 = vadd.f32 %v806_v59, %v441_v57  ;;  %v576_v62 = vpop.f32.mrb[15].mxu1  ;;  %817 = vmatprep.subr.bf16.mxu0 %v879_v60  ;;  %v602_v0 = vmax.f32 %v582_v55, 0.0 }
 0x1f2   :  { %v577_v63 = vadd.f32 %v576_v62, %v431_v45  ;;  %v600_v2 = vmax.f32 %v574_v58, 0.0 }
 0x1f3   :  { %v603_v1 = vmax.f32 %v585_v61, 0.0 }
 0x1f4   :  { %v601_v3 = vmax.f32 %v577_v63, 0.0  ;;  %818 = vmatpush3.bf16.msra.mxu0 %v610_v51 }
 0x1f5   :  { %v612_v4 = vpack.c.bf16 %v603_v1, %v602_v0  ;;  %819 = vmatprep.subr.bf16.mxu0 %v879_v60 }
 0x1f6   :  { %v611_v5 = vpack.c.bf16 %v601_v3, %v600_v2 }
 0x1f8   :  { %820 = vmatpush3.bf16.msra.mxu0 %v611_v5 }
 0x1f9   :  { %821 = vmatprep.subr.bf16.mxu0 %v879_v60 }
 0x1fc   :  { %822 = vmatpush3.bf16.msra.mxu0 %v612_v4 }
 0x1ff   :  { %824 = vmatmul.mubr.bf16.vlgmr.msra.gmra.mrb[16].mxu0 %v604_v6 }
 0x2d2   :  { %v653_v8 = vpop.f32.mrb[16].mxu0 }
 0x2d3   :  { %v654_v9 = vadd.f32 %v653_v8, %v617_v7  ;;  %v825_v10 = vpop.f32.mrb[17].mxu0 }
 0x2d4   :  { %v656_v11 = vpop.f32.mrb[18].mxu0 }
 0x2d5   :  { %v662_v12 = vand.u32 2147483647, %v654_v9  ;;  %v826_v13 = vpop.f32.mrb[19].mxu0  ;;  %v659_v25 = vmax.f32 %v654_v9, 0.0  ;;  %vm660_vm6 = vcmp.ne.f32.partialorder %v654_v9, %v654_v9 }
 0x2d7   :  { %v663_v14 = vsub.f32 0.0, %v662_v12 }
 0x2d9   :  { %v664_v15 = vmul.f32 1.442695, %v663_v14 }
 0x2db   :  { %850 = vpow2.f32 %v664_v15 }
 0x2e5   :  { %v851_v16 = vpop.eup %850 }
 0x2e6   :  { %v666_v17 = vadd.f32 1.0, %v851_v16  ;;  %v669_v60 = vmul.f32 -0.5, %v851_v16  ;;  %v672_v20 = vand.u32 2147483647, %v851_v16 }
 0x2e8   :  { %852 = vlog2.f32 %v666_v17  ;;  %v670_v19 = vadd.f32 1.0, %v669_v60  ;;  %vm673_vm3 = vcmp.lt.f32.partialorder %v672_v20, 0.0004427343 }
 0x2ea   :  { %v671_v24 = vmul.f32 %v851_v16, %v670_v19 }
 0x2f2   :  { %v853_v22 = vpop.eup %852 }
 0x2f3   :  { %v668_v23 = vmul.f32 0.6931472, %v853_v22 }
 0x2f5   :  { %v674_v26 = vsel %vm673_vm3, %v671_v24, %v668_v23 }
 0x2f6   :  { %v675_v27 = vadd.f32 %v674_v26, %v659_v25 }
 0x2f8   :  { %v676_v28 = vsel %vm660_vm6, %v654_v9, %v675_v27 }
 0x2f9   :  { %v677_v29 = vadd.f32 0.0001, %v676_v28 }
 0x2fb   :  { %v683_v30 = vsel %vm682_vm7, %v677_v29, %v654_v9 }
 0x2fc   :  { %684 = vst [vmem:[#allocation2] sm:$0xff] %v683_v30 }
 0x2fd   :  { %865 = shalt.err (!%p862_p4)
}
 0x2fe   :  { %s866_s26 = scalar_lea.hbm %s1111_s7, 128 }
 0x2ff   :  { %p867_p5 = scmp.ne.s32.totalorder %s1111_s7, %s866_s26  ;;  %p870_p6 = scmp.lt.u32.totalorder %s866_s26, %s1111_s7 }
 0x301   :  { %p872_p7 = pnand %p870_p6, %p867_p5 }
 0x303   :  { %875 = shalt.err (!%p872_p7)
}
 0x304   :  { %694 = dma.vmem_to_hbm [thread:$0]  %s692_s22, 128, %s1111_s7, [#allocation3]  }
 0x305   :  { %876 = dma.done.wait [#allocation3], 128  }
 0x306   :  { %877 = vsyncadd [#allocation3], 4294967168 }
 0x307   :  { %698 = vsyncpa [#allocation3], 1 }

</bundles_post_ra>
